<compile_context>
chip_gen: v7x
topology: tpu7x:2x2x1
jax: 0.10.0
libtpu: 0.0.40
codegen_flags: <defaults>
</compile_context>

<pallas_src>
import jax
import jax.numpy as jnp
from jax import lax
from jax.experimental import pallas as pl
from jax.experimental.pallas import tpu as pltpu


def _basic_block_kernel(x_ref, wb1_ref, wb2_ref, bias_ref, out_ref, pad_ref):
    """Fused BasicBlock forward for a B-image batch tile.

    x_ref    : (B, H, W*C)     bf16  lane-dense NHWC input (W and C flattened)
    wb*_ref  : (3, W*C, W*C)   bf16  block-Toeplitz 3x3 conv weights with the
                                     folded BN scale baked into the columns,
                                     one slab per kh tap
    bias_ref : (2, W*C)        f32   folded BN biases (row 0: BN1, row 1: BN2)
    out_ref  : (B, H, W*C)     bf16
    pad_ref  : (B*S, W*C)      bf16  scratch; image b occupies rows
                                     [b*S, b*S + H + 2): top halo, H interior
                                     rows, bottom halo.  Rows past H+2 inside an
                                     image's S-row frame are filler and are
                                     never read by the shift-add.
    """
    B, H, WC = x_ref.shape
    S = pad_ref.shape[0] // B

    # Re-zero only the per-image height-halo rows (two 1-row stores per image).
    # Safe under megacore grid splitting (no program_id==0 gated init).
    zero_row = jnp.zeros((1, WC), pad_ref.dtype)
    for b in range(B):
        pad_ref[b * S:b * S + 1, :] = zero_row
        pad_ref[b * S + H + 1:b * S + H + 2, :] = zero_row

    def conv_all_taps(wb_ref):
        # One aligned, lane-dense MXU matmul per kh tap over the WHOLE stacked
        # slab (M = B*S, K = N = W*C).  The W-taps and the width zero-padding
        # live in the block-Toeplitz weights; the height padding lives in the
        # slab's zero halo rows.
        p = pad_ref[...]
        z0 = jnp.dot(p, wb_ref[0], preferred_element_type=jnp.float32)
        z1 = jnp.dot(p, wb_ref[1], preferred_element_type=jnp.float32)
        z2 = jnp.dot(p, wb_ref[2], preferred_element_type=jnp.float32)
        return z0, z1, z2

    def gather(z, b):
        # out[h] = Z0[h] + Z1[h+1] + Z2[h+2]   (rows relative to image b's frame)
        z0, z1, z2 = z
        r = b * S
        return z0[r:r + H] + z1[r + 1:r + 1 + H] + z2[r + 2:r + 2 + H]

    # ---- conv1 (+ folded BN1) + ReLU ---------------------------------------
    for b in range(B):
        pad_ref[b * S + 1:b * S + 1 + H, :] = x_ref[b]        # interior <- x
    z = conv_all_taps(wb1_ref)
    b1 = bias_ref[0:1, :]
    for b in range(B):
        y1 = jnp.maximum(gather(z, b) + b1, 0.0)              # BN1 bias + ReLU
        pad_ref[b * S + 1:b * S + 1 + H, :] = y1.astype(pad_ref.dtype)

    # ---- conv2 (+ folded BN2) + residual + ReLU ----------------------------
    z = conv_all_taps(wb2_ref)
    b2 = bias_ref[1:2, :]
    for b in range(B):
        y2 = gather(z, b) + b2 + x_ref[b].astype(jnp.float32)
        out_ref[b] = jnp.maximum(y2, 0.0).astype(out_ref.dtype)


def _block_toeplitz(w_hwio, W):
    """(3, 3, Cin, Co) HWIO conv weights -> (3, W*Cin, W*Co) banded slabs.

    slab[kh][w_in*Cin + ci, w_out*Co + co] = w_hwio[kh, kw, ci, co]
    with w_in = w_out + kw - 1; taps that would read the width padding have no
    entry (zero), folding the W zero-padding into the weights.
    """
    _, _, cin, co = w_hwio.shape
    wi = jnp.arange(W)[:, None]      # input  width index
    wo = jnp.arange(W)[None, :]      # output width index
    slabs = []
    for kh in range(3):
        slab = jnp.zeros((W * cin, W * co), w_hwio.dtype)
        for kw in range(3):
            sel = (wi == wo + (kw - 1)).astype(w_hwio.dtype)   # (W, W) band
            slab = slab + jnp.kron(sel, w_hwio[kh, kw])
        slabs.append(slab)
    return jnp.stack(slabs, axis=0)


def _pick_batch_tile(n, s, max_rows=256):
    """Largest batch tile B dividing n with B*s <= max_rows, preferring an even
    grid length (n // B) so both v7x TensorCores get work under 'parallel'."""
    best_even = best_any = None
    for b in range(1, n + 1):
        if n % b or b * s > max_rows:
            continue
        best_any = b
        if (n // b) % 2 == 0:
            best_even = b
    return best_even or best_any or 1


def basic_block_pallas(x_nchw, w1, g1, be1, rm1, rv1, w2, g2, be2, rm2, rv2,
                       eps=1e-5):
    """x_nchw: (N, Cin, H, W) f32; w1: (C, Cin, 3, 3); w2: (C, C, 3, 3).

    Returns the BasicBlock output in NCHW layout, bf16 (the kernel's output /
    downstream compute dtype).  Only module defaults are supported.
    """
    N, Cin, H, W = x_nchw.shape
    C = w1.shape[0]
    assert Cin == C, "identity residual path needs in_kernels == kernels"
    WC = W * C

    S = ((H + 2 + 15) // 16) * 16        # per-image row stride (bf16 pack align)
    B = _pick_batch_tile(N, S)
    grid_n = N // B

    # --- glue: NCHW -> lane-dense (N, H, W*C) bf16 --------------------------
    x2d = (jnp.transpose(x_nchw, (0, 2, 3, 1))
           .reshape(N, H, WC).astype(jnp.bfloat16))

    # --- glue: fold inference BatchNorm into per-channel scale / bias -------
    def fold(g, b, rm, rv):
        scale = g / jnp.sqrt(rv + eps)
        return scale, b - rm * scale
    s1, b1 = fold(g1, be1, rm1, rv1)
    s2, b2 = fold(g2, be2, rm2, rv2)

    # --- glue: OIHW weights -> block-Toeplitz slabs with BN scale folded ----
    def make_slab(w_oihw, scale):
        slab = _block_toeplitz(jnp.transpose(w_oihw, (2, 3, 1, 0)), W)
        return (slab * jnp.tile(scale, W)[None, None, :]).astype(jnp.bfloat16)
    wb1 = make_slab(w1, s1)
    wb2 = make_slab(w2, s2)

    # Remaining per-lane biases packed into a single (2, W*C) f32 operand.
    bias = jnp.stack([jnp.tile(b1, W), jnp.tile(b2, W)]).astype(jnp.float32)

    # --- VMEM budget (actual footprint + headroom) and advisory cost --------
    act_block = B * H * WC * 2                       # one bf16 activation block
    block_bytes = (2 * act_block                     # x block, double-buffered
                   + 2 * act_block                   # out block, double-buffered
                   + 2 * 3 * WC * WC * 2             # wb1 + wb2, single-buffered
                   + 2 * WC * 4                      # bias pack, single-buffered
                   + B * S * WC * 2)                 # padded slab scratch
    vmem_limit = int(min(block_bytes + (4 << 20), 48 << 20))

    flops = grid_n * 2 * 3 * 2 * (B * S) * WC * WC
    bytes_accessed = (2 * N * H * WC * 2             # bf16 in + bf16 out
                      + 2 * 3 * WC * WC * 2 + 2 * WC * 4)

    out2d = pl.pallas_call(
        _basic_block_kernel,
        out_shape=jax.ShapeDtypeStruct((N, H, WC), jnp.bfloat16),
        grid_spec=pltpu.PrefetchScalarGridSpec(
            num_scalar_prefetch=0,
            grid=(grid_n,),
            in_specs=[
                pl.BlockSpec((B, H, WC), lambda i: (i, 0, 0)),
                pl.BlockSpec((3, WC, WC), lambda i: (0, 0, 0),
                             pipeline_mode=pl.Buffered(1)),
                pl.BlockSpec((3, WC, WC), lambda i: (0, 0, 0),
                             pipeline_mode=pl.Buffered(1)),
                pl.BlockSpec((2, WC), lambda i: (0, 0),
                             pipeline_mode=pl.Buffered(1)),
            ],
            out_specs=pl.BlockSpec((B, H, WC), lambda i: (i, 0, 0)),
            scratch_shapes=[pltpu.VMEM((B * S, WC), jnp.bfloat16)],
        ),
        compiler_params=pltpu.CompilerParams(
            dimension_semantics=("parallel",),
            vmem_limit_bytes=vmem_limit),
        cost_estimate=pl.CostEstimate(flops=flops, transcendentals=0,
                                      bytes_accessed=bytes_accessed),
    )(x2d, wb1, wb2, bias)

    # --- glue: back to the module's NCHW I/O convention (bf16 output) -------
    return jnp.transpose(out2d.reshape(N, H, W, C), (0, 3, 1, 2))


def _reference_jax(x_nchw, w1, g1, be1, rm1, rv1, w2, g2, be2, rm2, rv2,
                   eps=1e-5):
    """Plain-JAX reference modelling the kernel's numerics: bf16 input, bf16
    scale-folded conv weights, bf16 conv2 input; f32 accumulation and all
    elementwise math in f32.  (The kernel additionally rounds its final output
    to bf16, which the test tolerance covers.)"""
    def q(a):
        return a.astype(jnp.bfloat16).astype(jnp.float32)

    def conv(a, w):   # a NCHW, w OIHW
        return lax.conv_general_dilated(
            a, w, window_strides=(1, 1), padding=((1, 1), (1, 1)),
            dimension_numbers=("NCHW", "OIHW", "NCHW"))

    def fold(g, b, rm, rv):
        scale = g / jnp.sqrt(rv + eps)
        return scale, b - rm * scale

    s1, b1 = fold(g1, be1, rm1, rv1)
    s2, b2 = fold(g2, be2, rm2, rv2)
    xq = q(x_nchw)
    y = conv(xq, q(w1 * s1[:, None, None, None])) + b1[None, :, None, None]
    y = q(jax.nn.relu(y))
    y = conv(y, q(w2 * s2[:, None, None, None])) + b2[None, :, None, None]
    return jax.nn.relu(y + xq)


if __name__ == "__main__":
    N, C, H, W = 4, 8, 16, 16          # W * C = 128 -> exactly one lane tile
    key = jax.random.PRNGKey(0)
    keys = jax.random.split(key, 8)

    x = jax.random.normal(keys[0], (N, C, H, W), jnp.float32)

    fan_in = C * 3 * 3
    w1 = jax.random.normal(keys[1], (C, C, 3, 3), jnp.float32) / jnp.sqrt(fan_in)
    w2 = jax.random.normal(keys[2], (C, C, 3, 3), jnp.float32) / jnp.sqrt(fan_in)

    # Deterministic, non-trivial BatchNorm parameters & running statistics.
    g1 = 1.0 + 0.1 * jax.random.normal(keys[3], (C,), jnp.float32)
    be1 = 0.1 * jax.random.normal(keys[4], (C,), jnp.float32)
    rm1 = 0.05 * jax.random.normal(keys[5], (C,), jnp.float32)
    rv1 = 1.0 + 0.1 * jnp.abs(jax.random.normal(keys[6], (C,), jnp.float32))
    g2 = 1.0 + 0.05 * jnp.cos(jnp.arange(C, dtype=jnp.float32))
    be2 = 0.05 * jnp.sin(jnp.arange(C, dtype=jnp.float32))
    rm2 = 0.02 * jnp.arange(C, dtype=jnp.float32) / C
    rv2 = 1.0 + 0.05 * jnp.arange(C, dtype=jnp.float32) / C

    args = (x, w1, g1, be1, rm1, rv1, w2, g2, be2, rm2, rv2)

    out = jax.block_until_ready(basic_block_pallas(*args))
    ref = jax.block_until_ready(_reference_jax(*args))

    assert out.shape == (N, C, H, W)
    out_f32 = out.astype(jnp.float32)
    max_err = float(jnp.max(jnp.abs(out_f32 - ref)))
    # Kernel output is bf16: allow ~1 bf16 ulp of the f32-math reference.
    assert jnp.allclose(out_f32, ref, atol=3e-3, rtol=1.5e-2), max_err

    print("KERNEL_OK")
</pallas_src>

<mosaic_0001>
module attributes {stable_mosaic.version = 11 : i64} {
  func.func @_basic_block_kernel(%arg0: i32, %arg1: memref<2x16x128xbf16, #tpu.memory_space<vmem>>, %arg2: memref<3x128x128xbf16, #tpu.memory_space<vmem>>, %arg3: memref<3x128x128xbf16, #tpu.memory_space<vmem>>, %arg4: memref<2x128xf32, #tpu.memory_space<vmem>>, %arg5: memref<2x16x128xbf16, #tpu.memory_space<vmem>>, %arg6: memref<64x128xbf16, #tpu.memory_space<vmem>>) attributes {dimension_semantics = [#tpu.dimension_semantics<parallel>], iteration_bounds = array<i64: 2>, scalar_prefetch = 0 : i64, scratch_operands = 1 : i64, tpu.core_type = #tpu.core_type<tc>, window_params = [{transform_indices = @transform_0, window_bounds = array<i64: 2, 16, 128>}, {pipeline_mode = #tpu.pipeline_mode<synchronous>, transform_indices = @transform_1, window_bounds = array<i64: 3, 128, 128>}, {pipeline_mode = #tpu.pipeline_mode<synchronous>, transform_indices = @transform_2, window_bounds = array<i64: 3, 128, 128>}, {pipeline_mode = #tpu.pipeline_mode<synchronous>, transform_indices = @transform_3, window_bounds = array<i64: 2, 128>}, {transform_indices = @transform_4, window_bounds = array<i64: 2, 16, 128>}]} {
    %cst = arith.constant 0.000000e+00 : bf16
    %0 = vector.broadcast %cst : bf16 to vector<1x128xbf16>
    %c0 = arith.constant 0 : index
    %c0_0 = arith.constant 0 : index
    %1 = vector.load %arg6[%c0, %c0_0] : memref<64x128xbf16, #tpu.memory_space<vmem>>, vector<1x128xbf16>
    tpu.vector_store %arg6[%c0, %c0_0], %0 {strides = array<i32>} : memref<64x128xbf16, #tpu.memory_space<vmem>>, vector<1x128xbf16>,
    %c17 = arith.constant 17 : index
    %c0_1 = arith.constant 0 : index
    %2 = vector.load %arg6[%c17, %c0_1] : memref<64x128xbf16, #tpu.memory_space<vmem>>, vector<1x128xbf16>
    tpu.vector_store %arg6[%c17, %c0_1], %0 {strides = array<i32>} : memref<64x128xbf16, #tpu.memory_space<vmem>>, vector<1x128xbf16>,
    %c32 = arith.constant 32 : index
    %c0_2 = arith.constant 0 : index
    %3 = vector.load %arg6[%c32, %c0_2] : memref<64x128xbf16, #tpu.memory_space<vmem>>, vector<1x128xbf16>
    tpu.vector_store %arg6[%c32, %c0_2], %0 {strides = array<i32>} : memref<64x128xbf16, #tpu.memory_space<vmem>>, vector<1x128xbf16>,
    %c49 = arith.constant 49 : index
    %c0_3 = arith.constant 0 : index
    %4 = vector.load %arg6[%c49, %c0_3] : memref<64x128xbf16, #tpu.memory_space<vmem>>, vector<1x128xbf16>
    tpu.vector_store %arg6[%c49, %c0_3], %0 {strides = array<i32>} : memref<64x128xbf16, #tpu.memory_space<vmem>>, vector<1x128xbf16>,
    %c0_4 = arith.constant 0 : index
    %c0_5 = arith.constant 0 : index
    %c0_6 = arith.constant 0 : index
    %5 = vector.load %arg1[%c0_4, %c0_5, %c0_6] : memref<2x16x128xbf16, #tpu.memory_space<vmem>>, vector<1x16x128xbf16>
    %6 = vector.shape_cast %5 : vector<1x16x128xbf16> to vector<16x128xbf16>
    %c1 = arith.constant 1 : index
    %c0_7 = arith.constant 0 : index
    %7 = vector.load %arg6[%c1, %c0_7] : memref<64x128xbf16, #tpu.memory_space<vmem>>, vector<16x128xbf16>
    tpu.vector_store %arg6[%c1, %c0_7], %6 {strides = array<i32>} : memref<64x128xbf16, #tpu.memory_space<vmem>>, vector<16x128xbf16>,
    %c1_8 = arith.constant 1 : index
    %c0_9 = arith.constant 0 : index
    %c0_10 = arith.constant 0 : index
    %8 = vector.load %arg1[%c1_8, %c0_9, %c0_10] : memref<2x16x128xbf16, #tpu.memory_space<vmem>>, vector<1x16x128xbf16>
    %9 = vector.shape_cast %8 : vector<1x16x128xbf16> to vector<16x128xbf16>
    %c33 = arith.constant 33 : index
    %c0_11 = arith.constant 0 : index
    %10 = vector.load %arg6[%c33, %c0_11] : memref<64x128xbf16, #tpu.memory_space<vmem>>, vector<16x128xbf16>
    tpu.vector_store %arg6[%c33, %c0_11], %9 {strides = array<i32>} : memref<64x128xbf16, #tpu.memory_space<vmem>>, vector<16x128xbf16>,
    %c0_12 = arith.constant 0 : index
    %c0_13 = arith.constant 0 : index
    %11 = vector.load %arg6[%c0_12, %c0_13] : memref<64x128xbf16, #tpu.memory_space<vmem>>, vector<64x128xbf16>
    %c0_14 = arith.constant 0 : index
    %c0_15 = arith.constant 0 : index
    %c0_16 = arith.constant 0 : index
    %12 = vector.load %arg2[%c0_14, %c0_15, %c0_16] : memref<3x128x128xbf16, #tpu.memory_space<vmem>>, vector<1x128x128xbf16>
    %13 = vector.shape_cast %12 : vector<1x128x128xbf16> to vector<128x128xbf16>
    %cst_17 = arith.constant dense<0.000000e+00> : vector<64x128xf32>
    %14 = tpu.matmul %11, %13, %cst_17 {dimension_numbers = #tpu.dot_dimension_numbers<[1], [0], [0], [1], [0, 0, 1, 1], [], []>} : vector<64x128xbf16>, vector<128x128xbf16>, vector<64x128xf32> -> vector<64x128xf32>
    %c1_18 = arith.constant 1 : index
    %c0_19 = arith.constant 0 : index
    %c0_20 = arith.constant 0 : index
    %15 = vector.load %arg2[%c1_18, %c0_19, %c0_20] : memref<3x128x128xbf16, #tpu.memory_space<vmem>>, vector<1x128x128xbf16>
    %16 = vector.shape_cast %15 : vector<1x128x128xbf16> to vector<128x128xbf16>
    %cst_21 = arith.constant dense<0.000000e+00> : vector<64x128xf32>
    %17 = tpu.matmul %11, %16, %cst_21 {dimension_numbers = #tpu.dot_dimension_numbers<[1], [0], [0], [1], [0, 0, 1, 1], [], []>} : vector<64x128xbf16>, vector<128x128xbf16>, vector<64x128xf32> -> vector<64x128xf32>
    %c2 = arith.constant 2 : index
    %c0_22 = arith.constant 0 : index
    %c0_23 = arith.constant 0 : index
    %18 = vector.load %arg2[%c2, %c0_22, %c0_23] : memref<3x128x128xbf16, #tpu.memory_space<vmem>>, vector<1x128x128xbf16>
    %19 = vector.shape_cast %18 : vector<1x128x128xbf16> to vector<128x128xbf16>
    %cst_24 = arith.constant dense<0.000000e+00> : vector<64x128xf32>
    %20 = tpu.matmul %11, %19, %cst_24 {dimension_numbers = #tpu.dot_dimension_numbers<[1], [0], [0], [1], [0, 0, 1, 1], [], []>} : vector<64x128xbf16>, vector<128x128xbf16>, vector<64x128xf32> -> vector<64x128xf32>
    %c0_25 = arith.constant 0 : index
    %c0_26 = arith.constant 0 : index
    %21 = vector.load %arg4[%c0_25, %c0_26] : memref<2x128xf32, #tpu.memory_space<vmem>>, vector<1x128xf32>
    %22 = vector.extract_strided_slice %14 {offsets = [0, 0], sizes = [16, 128], strides = [1, 1]} : vector<64x128xf32> to vector<16x128xf32>
    %23 = vector.extract_strided_slice %17 {offsets = [1, 0], sizes = [16, 128], strides = [1, 1]} : vector<64x128xf32> to vector<16x128xf32>
    %24 = arith.addf %22, %23 : vector<16x128xf32>
    %25 = vector.extract_strided_slice %20 {offsets = [2, 0], sizes = [16, 128], strides = [1, 1]} : vector<64x128xf32> to vector<16x128xf32>
    %26 = arith.addf %24, %25 : vector<16x128xf32>
    %27 = vector.broadcast %21 : vector<1x128xf32> to vector<16x128xf32>
    %28 = arith.addf %26, %27 : vector<16x128xf32>
    %cst_27 = arith.constant 0.000000e+00 : f32
    %29 = vector.broadcast %cst_27 : f32 to vector<16x128xf32>
    %30 = arith.maximumf %28, %29 : vector<16x128xf32>
    %31 = arith.truncf %30 : vector<16x128xf32> to vector<16x128xbf16>
    %c1_28 = arith.constant 1 : index
    %c0_29 = arith.constant 0 : index
    %32 = vector.load %arg6[%c1_28, %c0_29] : memref<64x128xbf16, #tpu.memory_space<vmem>>, vector<16x128xbf16>
    tpu.vector_store %arg6[%c1_28, %c0_29], %31 {strides = array<i32>} : memref<64x128xbf16, #tpu.memory_space<vmem>>, vector<16x128xbf16>,
    %33 = vector.extract_strided_slice %14 {offsets = [32, 0], sizes = [16, 128], strides = [1, 1]} : vector<64x128xf32> to vector<16x128xf32>
    %34 = vector.extract_strided_slice %17 {offsets = [33, 0], sizes = [16, 128], strides = [1, 1]} : vector<64x128xf32> to vector<16x128xf32>
    %35 = arith.addf %33, %34 : vector<16x128xf32>
    %36 = vector.extract_strided_slice %20 {offsets = [34, 0], sizes = [16, 128], strides = [1, 1]} : vector<64x128xf32> to vector<16x128xf32>
    %37 = arith.addf %35, %36 : vector<16x128xf32>
    %38 = vector.broadcast %21 : vector<1x128xf32> to vector<16x128xf32>
    %39 = arith.addf %37, %38 : vector<16x128xf32>
    %cst_30 = arith.constant 0.000000e+00 : f32
    %40 = vector.broadcast %cst_30 : f32 to vector<16x128xf32>
    %41 = arith.maximumf %39, %40 : vector<16x128xf32>
    %42 = arith.truncf %41 : vector<16x128xf32> to vector<16x128xbf16>
    %c33_31 = arith.constant 33 : index
    %c0_32 = arith.constant 0 : index
    %43 = vector.load %arg6[%c33_31, %c0_32] : memref<64x128xbf16, #tpu.memory_space<vmem>>, vector<16x128xbf16>
    tpu.vector_store %arg6[%c33_31, %c0_32], %42 {strides = array<i32>} : memref<64x128xbf16, #tpu.memory_space<vmem>>, vector<16x128xbf16>,
    %c0_33 = arith.constant 0 : index
    %c0_34 = arith.constant 0 : index
    %44 = vector.load %arg6[%c0_33, %c0_34] : memref<64x128xbf16, #tpu.memory_space<vmem>>, vector<64x128xbf16>
    %c0_35 = arith.constant 0 : index
    %c0_36 = arith.constant 0 : index
    %c0_37 = arith.constant 0 : index
    %45 = vector.load %arg3[%c0_35, %c0_36, %c0_37] : memref<3x128x128xbf16, #tpu.memory_space<vmem>>, vector<1x128x128xbf16>
    %46 = vector.shape_cast %45 : vector<1x128x128xbf16> to vector<128x128xbf16>
    %cst_38 = arith.constant dense<0.000000e+00> : vector<64x128xf32>
    %47 = tpu.matmul %44, %46, %cst_38 {dimension_numbers = #tpu.dot_dimension_numbers<[1], [0], [0], [1], [0, 0, 1, 1], [], []>} : vector<64x128xbf16>, vector<128x128xbf16>, vector<64x128xf32> -> vector<64x128xf32>
    %c1_39 = arith.constant 1 : index
    %c0_40 = arith.constant 0 : index
    %c0_41 = arith.constant 0 : index
    %48 = vector.load %arg3[%c1_39, %c0_40, %c0_41] : memref<3x128x128xbf16, #tpu.memory_space<vmem>>, vector<1x128x128xbf16>
    %49 = vector.shape_cast %48 : vector<1x128x128xbf16> to vector<128x128xbf16>
    %cst_42 = arith.constant dense<0.000000e+00> : vector<64x128xf32>
    %50 = tpu.matmul %44, %49, %cst_42 {dimension_numbers = #tpu.dot_dimension_numbers<[1], [0], [0], [1], [0, 0, 1, 1], [], []>} : vector<64x128xbf16>, vector<128x128xbf16>, vector<64x128xf32> -> vector<64x128xf32>
    %c2_43 = arith.constant 2 : index
    %c0_44 = arith.constant 0 : index
    %c0_45 = arith.constant 0 : index
    %51 = vector.load %arg3[%c2_43, %c0_44, %c0_45] : memref<3x128x128xbf16, #tpu.memory_space<vmem>>, vector<1x128x128xbf16>
    %52 = vector.shape_cast %51 : vector<1x128x128xbf16> to vector<128x128xbf16>
    %cst_46 = arith.constant dense<0.000000e+00> : vector<64x128xf32>
    %53 = tpu.matmul %44, %52, %cst_46 {dimension_numbers = #tpu.dot_dimension_numbers<[1], [0], [0], [1], [0, 0, 1, 1], [], []>} : vector<64x128xbf16>, vector<128x128xbf16>, vector<64x128xf32> -> vector<64x128xf32>
    %c1_47 = arith.constant 1 : index
    %c0_48 = arith.constant 0 : index
    %54 = vector.load %arg4[%c1_47, %c0_48] : memref<2x128xf32, #tpu.memory_space<vmem>>, vector<1x128xf32>
    %55 = vector.extract_strided_slice %47 {offsets = [0, 0], sizes = [16, 128], strides = [1, 1]} : vector<64x128xf32> to vector<16x128xf32>
    %56 = vector.extract_strided_slice %50 {offsets = [1, 0], sizes = [16, 128], strides = [1, 1]} : vector<64x128xf32> to vector<16x128xf32>
    %57 = arith.addf %55, %56 : vector<16x128xf32>
    %58 = vector.extract_strided_slice %53 {offsets = [2, 0], sizes = [16, 128], strides = [1, 1]} : vector<64x128xf32> to vector<16x128xf32>
    %59 = arith.addf %57, %58 : vector<16x128xf32>
    %60 = vector.broadcast %54 : vector<1x128xf32> to vector<16x128xf32>
    %61 = arith.addf %59, %60 : vector<16x128xf32>
    %c0_49 = arith.constant 0 : index
    %c0_50 = arith.constant 0 : index
    %c0_51 = arith.constant 0 : index
    %62 = vector.load %arg1[%c0_49, %c0_50, %c0_51] : memref<2x16x128xbf16, #tpu.memory_space<vmem>>, vector<1x16x128xbf16>
    %63 = vector.shape_cast %62 : vector<1x16x128xbf16> to vector<16x128xbf16>
    %64 = arith.extf %63 : vector<16x128xbf16> to vector<16x128xf32>
    %65 = arith.addf %61, %64 : vector<16x128xf32>
    %cst_52 = arith.constant 0.000000e+00 : f32
    %66 = vector.broadcast %cst_52 : f32 to vector<16x128xf32>
    %67 = arith.maximumf %65, %66 : vector<16x128xf32>
    %68 = arith.truncf %67 : vector<16x128xf32> to vector<16x128xbf16>
    %c0_53 = arith.constant 0 : index
    %c0_54 = arith.constant 0 : index
    %c0_55 = arith.constant 0 : index
    %69 = vector.load %arg5[%c0_53, %c0_54, %c0_55] : memref<2x16x128xbf16, #tpu.memory_space<vmem>>, vector<1x16x128xbf16>
    %70 = vector.shape_cast %69 : vector<1x16x128xbf16> to vector<16x128xbf16>
    %71 = vector.shape_cast %68 : vector<16x128xbf16> to vector<1x16x128xbf16>
    tpu.vector_store %arg5[%c0_53, %c0_54, %c0_55], %71 {strides = array<i32>} : memref<2x16x128xbf16, #tpu.memory_space<vmem>>, vector<1x16x128xbf16>,
    %72 = vector.extract_strided_slice %47 {offsets = [32, 0], sizes = [16, 128], strides = [1, 1]} : vector<64x128xf32> to vector<16x128xf32>
    %73 = vector.extract_strided_slice %50 {offsets = [33, 0], sizes = [16, 128], strides = [1, 1]} : vector<64x128xf32> to vector<16x128xf32>
    %74 = arith.addf %72, %73 : vector<16x128xf32>
    %75 = vector.extract_strided_slice %53 {offsets = [34, 0], sizes = [16, 128], strides = [1, 1]} : vector<64x128xf32> to vector<16x128xf32>
    %76 = arith.addf %74, %75 : vector<16x128xf32>
    %77 = vector.broadcast %54 : vector<1x128xf32> to vector<16x128xf32>
    %78 = arith.addf %76, %77 : vector<16x128xf32>
    %c1_56 = arith.constant 1 : index
    %c0_57 = arith.constant 0 : index
    %c0_58 = arith.constant 0 : index
    %79 = vector.load %arg1[%c1_56, %c0_57, %c0_58] : memref<2x16x128xbf16, #tpu.memory_space<vmem>>, vector<1x16x128xbf16>
    %80 = vector.shape_cast %79 : vector<1x16x128xbf16> to vector<16x128xbf16>
    %81 = arith.extf %80 : vector<16x128xbf16> to vector<16x128xf32>
    %82 = arith.addf %78, %81 : vector<16x128xf32>
    %cst_59 = arith.constant 0.000000e+00 : f32
    %83 = vector.broadcast %cst_59 : f32 to vector<16x128xf32>
    %84 = arith.maximumf %82, %83 : vector<16x128xf32>
    %85 = arith.truncf %84 : vector<16x128xf32> to vector<16x128xbf16>
    %c1_60 = arith.constant 1 : index
    %c0_61 = arith.constant 0 : index
    %c0_62 = arith.constant 0 : index
    %86 = vector.load %arg5[%c1_60, %c0_61, %c0_62] : memref<2x16x128xbf16, #tpu.memory_space<vmem>>, vector<1x16x128xbf16>
    %87 = vector.shape_cast %86 : vector<1x16x128xbf16> to vector<16x128xbf16>
    %88 = vector.shape_cast %85 : vector<16x128xbf16> to vector<1x16x128xbf16>
    tpu.vector_store %arg5[%c1_60, %c0_61, %c0_62], %88 {strides = array<i32>} : memref<2x16x128xbf16, #tpu.memory_space<vmem>>, vector<1x16x128xbf16>,
    return
  }
  func.func @transform_0(%arg0: i32) -> (i32, i32, i32) {
    %c0_i32 = arith.constant 0 : i32
    %c0_i32_0 = arith.constant 0 : i32
    %c0_i32_1 = arith.constant 0 : i32
    return %arg0, %c0_i32, %c0_i32_0 : i32, i32, i32
  }
  func.func @transform_1(%arg0: i32) -> (i32, i32, i32) {
    %c0_i32 = arith.constant 0 : i32
    %c0_i32_0 = arith.constant 0 : i32
    %c0_i32_1 = arith.constant 0 : i32
    %c0_i32_2 = arith.constant 0 : i32
    return %c0_i32, %c0_i32_0, %c0_i32_1 : i32, i32, i32
  }
  func.func @transform_2(%arg0: i32) -> (i32, i32, i32) {
    %c0_i32 = arith.constant 0 : i32
    %c0_i32_0 = arith.constant 0 : i32
    %c0_i32_1 = arith.constant 0 : i32
    %c0_i32_2 = arith.constant 0 : i32
    return %c0_i32, %c0_i32_0, %c0_i32_1 : i32, i32, i32
  }
  func.func @transform_3(%arg0: i32) -> (i32, i32) {
    %c0_i32 = arith.constant 0 : i32
    %c0_i32_0 = arith.constant 0 : i32
    %c0_i32_1 = arith.constant 0 : i32
    return %c0_i32, %c0_i32_0 : i32, i32
  }
  func.func @transform_4(%arg0: i32) -> (i32, i32, i32) {
    %c0_i32 = arith.constant 0 : i32
    %c0_i32_0 = arith.constant 0 : i32
    %c0_i32_1 = arith.constant 0 : i32
    return %arg0, %c0_i32, %c0_i32_0 : i32, i32, i32
  }
}

</mosaic_0001>

<bundles_post_ra>
// kernel: tpu_custom_call.1
= control target key start
LH: loop header
LB: loop body
LE: loop exit
PB: predicated region body
PF: predicated region fallthrough
CT: control target
= control target key end

     0   :  { %9 = vsyncpa [#allocation4], 0  ;;  %s2346_s0 = inlined_call_operand.hbm [shape: bf16[4,16,128], index: 0, kind: input, shape index: {}]   ;;  %s2347_s1 = inlined_call_operand.hbm [shape: bf16[3,128,128], index: 1, kind: input, shape index: {}]   ;;  %s2348_s2 = inlined_call_operand.hbm [shape: bf16[3,128,128], index: 2, kind: input, shape index: {}]   ;;  %s2349_s3 = inlined_call_operand.vmem [shape: f32[2,128], index: 3, kind: input, shape index: {}]   ;;  %s2350_s4 = inlined_call_operand.hbm [shape: bf16[4,16,128], index: 4, kind: output, shape index: {}]  }
   0x1   :  { %11 = vsyncpa [#allocation4 + $0x1], 0 }
   0x2   :  { %12 = vsyncpa [#allocation7], 0 }
   0x3   :  { %13 = vsyncpa [#allocation5], 0 }
   0x4   :  { %15 = vsyncpa [#allocation5 + $0x1], 0  ;;  %s2017_s15 = smov 0   ;;  %s2019_s16 = smov 0  }
   0x5   :  { %s2021_s17 = smov 0   ;;  %s2023_s18 = smov 0  }
   0x6 LB: > { %s2038_s19 = sadd.s32 4294967295, %s1982_s18   ;;  %s1379_s20 = sadd.s32 4294967294, %s1982_s18   ;;  %s1982_s18 = sphi %s2023_s18, %s2376_s18   ;;  %s1978_s17 = sphi %s2021_s17, %s2375_s17   ;;  %s1974_s16 = sphi %s2019_s16, %s2374_s16   ;;  %s1970_s15 = sphi %s2017_s15, %s2373_s15  }
   0x7   : > { %p41_p0 = scmp.ne.s32.totalorder %s1974_s16, %s1970_s15  ;;  %p2351_p1 = scmp.eq.s32.totalorder %s2038_s19, 0 }
   0x8   : > { %p134_p3 = scmp.eq.s32.totalorder %s1379_s20, 1  ;;  %p1380_p5 = scmp.ge.s32.totalorder %s1982_s18, 1 }
   0x9   : > { %p2047_p4 = por %p2351_p1, %p41_p0  ;;  %p141_p7 = scmp.lt.s32.totalorder %s1982_s18, 3 }
   0xa   : > { %p2052_p6 = por %p134_p3, %p41_p0  ;;  %s1984_s24 = smov [#allocation6]  }
   0xb   : > { %s2354_s21 = scalar_select %p2047_p4, 1, 0 }
   0xc   : > { %s2355_s22 = scalar_select %p2052_p6, 1, 0 }
   0xd   : > { %p2057_p8 = pnand %p1380_p5, %p141_p7  ;;  %s153_s25 = sshll.u32 %s1984_s24, 4  ;;  %s2061_s25 = int_to_ptr.vmem [resolvable:$true] %s153_s25 }
   0xe   : > { %s1985_s27 = smov [#allocation8]   ;;  %s1826_s5 = scalar_lea.hbm %s2347_s1, 3072 }
   0xf   : > { %p1717_p9 = pneg %p2057_p8  ;;  %s166_s28 = sshll.u32 %s1985_s27, 4  ;;  %s2072_s28 = int_to_ptr.vmem [resolvable:$true] %s166_s28 }
  0x10   : > { %p1827_p12 = scmp.ne.s32.totalorder %s2347_s1, %s1826_s5  ;;  %p1833_p5 = scmp.lt.u32.totalorder %s1826_s5, %s2347_s1 }
  0x11   : > { %p2068_p11 = pnand %p1717_p9, %p2351_p1 }
  0x13   : > { %p1828_p13 = pneg %p2068_p11 }
  0x15   : > { %p1829_p0 = pnand %p1828_p13, %p1827_p12 }
  0x17   : > { %p1830_p3 = pneg %p1829_p0 }
  0x19   : > { %p1835_p7 = pnand %p1833_p5, %p1830_p3 }
  0x1b   : > { %1838 = shalt.err (!%p1835_p7)
}
  0x1c   : > { %s1839_s10 = scalar_lea.vmem %s2061_s25, 3072  ;;  %p1847_p2 = scmp.lt.s32.totalorder %s2061_s25, %s2061_s25 }
  0x1d   : > { %p1840_p9 = scmp.ne.s32.totalorder %s2061_s25, %s1839_s10  ;;  %p1848_p12 = scmp.lt.s32.totalorder %s1839_s10, %s1839_s10 }
  0x1f   : > { %p1842_p10 = pnand %p1840_p9, %p1828_p13  ;;  %p1849_p0 = por %p1848_p12, %p1847_p2 }
  0x21   : > { %p1843_p1 = pneg %p1842_p10 }
  0x23   : > { %p1850_p6 = pnand %p1849_p0, %p1843_p1 }
  0x25   : > { %1853 = shalt.err (!%p1850_p6)
}
  0x26   : > { %s1986_s11 = smov 64   ;;  %s1987_s12 = smov 4  }
  0x27   : > { %1720 = dma.hbm_to_vmem [thread:$0]  (!%p2068_p11), %s2347_s1, 3072, %s2061_s25, [#allocation7], %s1986_s11, %s1986_s11, %s1987_s12  }
  0x28   : > { %s1854_s27 = scalar_lea.hbm %s2348_s2, 3072 }
  0x29   : > { %p1855_p1 = scmp.ne.s32.totalorder %s2348_s2, %s1854_s27  ;;  %p1861_p10 = scmp.lt.u32.totalorder %s1854_s27, %s2348_s2 }
  0x2b   : > { %p1857_p2 = pnand %p1855_p1, %p1828_p13 }
  0x2d   : > { %p1858_p6 = pneg %p1857_p2 }
  0x2f   : > { %p1863_p3 = pnand %p1861_p10, %p1858_p6 }
  0x31   : > { %1866 = shalt.err (!%p1863_p3)
}
  0x32   : > { %s1867_s25 = scalar_lea.vmem %s2072_s28, 3072  ;;  %p1875_p12 = scmp.lt.s32.totalorder %s2072_s28, %s2072_s28 }
  0x33   : > { %p1868_p5 = scmp.ne.s32.totalorder %s2072_s28, %s1867_s25  ;;  %p1876_p0 = scmp.lt.s32.totalorder %s1867_s25, %s1867_s25 }
  0x35   : > { %p1870_p7 = pnand %p1868_p5, %p1828_p13  ;;  %p1877_p1 = por %p1876_p0, %p1875_p12 }
  0x37   : > { %p1871_p9 = pneg %p1870_p7 }
  0x39   : > { %p1878_p2 = pnand %p1877_p1, %p1871_p9 }
  0x3b   : > { %1881 = shalt.err (!%p1878_p2)
}
  0x3c   : > { %1723 = dma.hbm_to_vmem [thread:$0]  (!%p2068_p11), %s2348_s2, 3072, %s2072_s28, [#allocation7], %s1986_s11, %s1986_s11, %s1987_s12  }
  0x3d   : > { %s2133_s26 = sadd.s32 1, %s1982_s18   ;;  %s28_s9 = sadd.s32 1, %s1978_s17 }
  0x3e   : > { %s25_s10 = ssub.s32 %s1982_s18, %s2133_s26  ;;  %p35_p13 = scmp.ne.s32.totalorder %s1978_s17, %s1974_s16 }
  0x3f   : > { %p26_p6 = scmp.eq.s32.totalorder %s25_s10, 0  ;;  %p36_p10 = scmp.eq.s32.totalorder %s1982_s18, 0 }
  0x40   : > { %p2358_p3 = scmp.eq.s32.totalorder %s2038_s19, 1  ;;  %p1734_p7 = scmp.lt.s32.totalorder %s1982_s18, 2 }
  0x41   : > { %s2149_s14 = scalar_select %p26_p6, %s1978_s17, %s28_s9  }
  0x42   : > { %p2143_p5 = por %p2358_p3, %p35_p13  ;;  %p37_p9 = por %p36_p10, %p35_p13 }
  0x43   : > { %s183_s20 = sand.u32 1, %s1978_s17   ;;  %s1462_s28 = sshll.u32 %s1982_s18, 8 }
  0x44   : > { %s2359_s13 = scalar_select %p2143_p5, 1, 0 }
  0x45   : > { %s1384_s24 = sshll.u32 %s183_s20, 4  ;;  %s2156_s30 = scalar_lea.hbm %s2346_s0, %s1462_s28 }
  0x46   : > { %s187_s5 = scalar_lea.vmem [#allocation3], %s1384_s24  ;;  %p2160_p11 = pnand %p1734_p7, %p37_p9 }
  0x47   : > { %s195_s6 = sshll.u32 %s187_s5, 4  ;;  %s2164_s7 = scalar_lea.sflag [#allocation4], %s183_s20  ;;  %s2158_s6 = int_to_ptr.vmem [resolvable:$true] %s195_s6 }
  0x48   : > { %s1882_s8 = scalar_lea.hbm %s2156_s30, 256  ;;  %p1884_p0 = pneg %p2160_p11 }
  0x49   : > { %p1883_p12 = scmp.ne.s32.totalorder %s2156_s30, %s1882_s8  ;;  %s1887_s24 = scalar_lea.hbm %s2346_s0, 512 }
  0x4a   : > { %p1888_p13 = scmp.lt.u32.totalorder %s2156_s30, %s2346_s0  ;;  %p1889_p6 = scmp.lt.u32.totalorder %s1887_s24, %s1882_s8 }
  0x4b   : > { %p1885_p1 = pnand %p1884_p0, %p1883_p12  ;;  %p1891_p3 = scmp.lt.u32.totalorder %s1882_s8, %s2156_s30 }
  0x4c   : > { %p1890_p10 = por %p1889_p6, %p1888_p13 }
  0x4d   : > { %p1886_p2 = pneg %p1885_p1 }
  0x4e   : > { %p1892_p7 = por %p1891_p3, %p1890_p10 }
  0x50   : > { %p1893_p9 = pnand %p1892_p7, %p1886_p2 }
  0x52   : > { %1896 = shalt.err (!%p1893_p9)
}
  0x53   : > { %s1897_s20 = scalar_lea.vmem %s2158_s6, 256  ;;  %s1988_s29 = smov [#allocation3]  }
  0x54   : > { %p1898_p12 = scmp.ne.s32.totalorder %s2158_s6, %s1897_s20  ;;  %s1902_s5 = sshll.u32 %s1988_s29, 4  ;;  %s1903_s5 = int_to_ptr.vmem [resolvable:$false] %s1902_s5 }
  0x55   : > { %s1904_s9 = scalar_lea.vmem %s1903_s5, 512  ;;  %p1905_p4 = scmp.lt.s32.totalorder %s2158_s6, %s1903_s5 }
  0x56   : > { %p1900_p1 = pnand %p1898_p12, %p1884_p0  ;;  %p1906_p13 = scmp.lt.s32.totalorder %s1904_s9, %s1897_s20 }
  0x58   : > { %p1901_p5 = pneg %p1900_p1  ;;  %p1907_p6 = por %p1906_p13, %p1905_p4 }
  0x5a   : > { %p1908_p10 = pnand %p1907_p6, %p1901_p5 }
  0x5c   : > { %1911 = shalt.err (!%p1908_p10)
}
  0x5d   : > { %1727 = dma.hbm_to_vmem [thread:$0]  (!%p2160_p11), %s2156_s30, 256, %s2158_s6, %s2164_s7, %s1986_s11, %s1986_s11, %s1987_s12  }
  0x5e   : > { %207 = sbr.rel (%p2057_p8) target bundleno = 692 (0x2b4), region = 36  ;;  %s2198_s8 = sand.u32 (!%p2057_p8), 1, %s1974_s16  }
  0x5f   : > { %s1389_s10 = sshll.u32 (!%p2057_p8), %s2198_s8, 4  ;;  %s210_s24 = scalar_lea.sflag (!%p2057_p8), [#allocation4], %s2198_s8 }
  0x60   : > { %s2204_s25 = scalar_lea.vmem (!%p2057_p8), [#allocation3], %s1389_s10  ;;  %p2361_p4 = scmp.ne.s32.totalorder (!%p2057_p8), %s2354_s21, 0 }
  0x65   : > { %1957 = dma.done.wait (%p2361_p4), %s210_s24, 256  }
  0x66   : > { %1959 = vsyncadd (%p2361_p4), %s210_s24, 4294967040  ;;  %p2362_p5 = scmp.eq.s32.totalorder %s2038_s19, 0 }
  0x68   : > { %1961 = dma.done.wait (%p2362_p5), [#allocation7], 6144   ;;  %p2363_p8 = pmov %p2362_p5 }
  0x69   : > { %v1776_v0 = vld [vmem:[#allocation6] sm:$0xff]   ;;  %v1778_v2 = vld [vmem:[#allocation6 + $0x8] sm:$0xff]   ;;  %v1780_v4 = vld [vmem:[#allocation6 + $0x10] sm:$0xff]   ;;  %vm250_vm0 = vsmask.f32 256  ;;  %vm249_vm2 = vcmask 1040384  }
  0x6a   : > { %1963 = vsyncadd (%p2363_p8), [#allocation7], 4294961152  ;;  %v1777_v1 = vld [vmem:[#allocation6 + $0x40] sm:$0xff]   ;;  %1561 = vmatprep.subr.bf16.mxu0 %v1776_v0  ;;  %v1779_v3 = vld [vmem:[#allocation6 + $0x48] sm:$0xff]   ;;  %vm255_vm1 = vsmask.f32 7938 }
  0x6b   : > { %1585 = vmatprep.subr.bf16.mxu1 %v1777_v1  ;;  %1562 = vmatpush3.bf16.msra.mxu0 %v1776_v0  ;;  %v1781_v5 = vld [vmem:[#allocation6 + $0x50] sm:$0xff]   ;;  %v1782_v6 = vld [vmem:[#allocation6 + $0x18] sm:$0xff]   ;;  %vm2214_vm3 = vmand %vm249_vm2, %vm250_vm0  ;;  %vm282_vm5 = vcmask 1047552   ;;  %vm702_vm7 = vcmask 1046528   ;;  %vm715_vm8 = vcmask 1045504   ;;  %s245_s30 = scalar_lea.vmem [#allocation9], %s1389_s10 }
  0x6c   : > { %1586 = vmatpush3.bf16.msra.mxu1 %v1777_v1  ;;  %1563 = vmatprep.subr.bf16.mxu0 %v1778_v2  ;;  %v1783_v7 = vld [vmem:[#allocation6 + $0x58] sm:$0xff]   ;;  %vm2219_vm4 = vmand %vm249_vm2, %vm255_vm1  ;;  %v1784_v10 = vld [vmem:[#allocation6 + $0x20] sm:$0xff]   ;;  %s1468_s6 = sshll.u32 %s2038_s19, 8  ;;  %s1287_s7 = sshll.u32 %s245_s30, 4  ;;  %s2302_s7 = int_to_ptr.vmem [resolvable:$true] %s1287_s7 }
  0x6d   : > { %1587 = vmatprep.subr.bf16.mxu1 %v1779_v3  ;;  %v1785_v11 = vld [vmem:[#allocation6 + $0x60] sm:$0xff]   ;;  %v1786_v12 = vld [vmem:[#allocation6 + $0x28] sm:$0xff]   ;;  %v1788_v19 = vld [vmem:[#allocation6 + $0x30] sm:$0xff]   ;;  %s2300_s20 = scalar_lea.hbm %s2350_s4, %s1468_s6  ;;  %s1273_s29 = scalar_lea.sflag [#allocation5], %s2198_s8 }
  0x6e   : > { %v1787_v13 = vld [vmem:[#allocation6 + $0x68] sm:$0xff]   ;;  %v252_v14 = vld [vmem:[#allocation2] sm:$0x1]  ;;  %vm2229_vm6 = vmand %vm282_vm5, %vm255_vm1  ;;  %s1912_s5 = scalar_lea.vmem %s2302_s7, 256  ;;  %p2370_p0 = scmp.ne.s32.totalorder %s2359_s13, 0 }
  0x6f   : > { %1564 = vmatpush3.bf16.msra.mxu0 %v1778_v2  ;;  %v253_v15 = vsel %vm2214_vm3, 0, %v252_v14  ;;  %v1792_v16 = vld [vmem:[%s2204_s25] sm:$0xff]   ;;  %v257_v17 = vld [vmem:[#allocation2 + $0x8] sm:$0x1]  ;;  %v1790_v25 = vld [vmem:[#allocation6 + $0x38] sm:$0xff]   ;;  %p1913_p11 = scmp.ne.s32.totalorder %s2302_s7, %s1912_s5  ;;  %s1989_s19 = smov [#allocation9]  }
  0x70   : > { %1588 = vmatpush3.bf16.msra.mxu1 %v1779_v3  ;;  %1565 = vmatprep.subr.bf16.mxu0 %v1780_v4  ;;  %254 = vst [vmem:[#allocation2] sm:$0x1] %v253_v15  ;;  %v258_v18 = vsel %vm2219_vm4, 0, %v257_v17  ;;  %v274_v20 = vshrl.u32 %v1792_v16, 16  ;;  %v277_v21 = vshll.u32 %v1792_v16, 16  ;;  %v1789_v23 = vld [vmem:[#allocation6 + $0x70] sm:$0xff]  }
  0x71   : > { %1589 = vmatprep.subr.bf16.mxu1 %v1781_v5  ;;  %259 = vst [vmem:[#allocation2 + $0x8] sm:$0x1] %v258_v18  ;;  %v260_v26 = vld [vmem:[#allocation2 + $0x10] sm:$0x1]  ;;  %v1798_v29 = vld [vmem:[%s2204_s25 + $0x8] sm:$0xff]   ;;  %v1793_v39 = vld [vmem:[#allocation6 + $0x80] sm:$0xff]   ;;  %p1914_p2 = pnand %p1913_p11, %p2370_p0 }
  0x72   : > { %v276_v24 = vrot.slane %v274_v20, 7  ;;  %v261_v28 = vsel %vm2214_vm3, 0, %v260_v26  ;;  %v263_v30 = vld [vmem:[#allocation2 + $0x18] sm:$0x1]  ;;  %v299_v33 = vshrl.u32 %v1798_v29, 16  ;;  %v302_v34 = vshll.u32 %v1798_v29, 16 }
  0x73   : > { %1566 = vmatpush3.bf16.msra.mxu0 %v1780_v4  ;;  %262 = vst [vmem:[#allocation2 + $0x10] sm:$0x1] %v261_v28  ;;  %v1791_v31 = vld [vmem:[#allocation6 + $0x78] sm:$0xff]   ;;  %v264_v35 = vsel %vm2219_vm4, 0, %v263_v30  ;;  %v1794_v43 = vld [vmem:[#allocation6 + $0x88] sm:$0xff]   ;;  %v1795_v48 = vld [vmem:[#allocation6 + $0x90] sm:$0xff]   ;;  %p1915_p3 = pneg %p1914_p2 }
  0x74   : > { %1590 = vmatpush3.bf16.msra.mxu1 %v1781_v5  ;;  %1567 = vmatprep.subr.bf16.mxu0 %v1782_v6  ;;  %v279_v27 = vor.u32 %v277_v21, %v276_v24  ;;  %265 = vst [vmem:[#allocation2 + $0x18] sm:$0x1] %v264_v35  ;;  %v301_v40 = vrot.slane %v299_v33, 7  ;;  %v1796_v49 = vld [vmem:[#allocation6 + $0x98] sm:$0xff]   ;;  %v1797_v51 = vld [vmem:[#allocation6 + $0xa0] sm:$0xff]   ;;  %v1799_v52 = vld [vmem:[#allocation6 + $0xa8] sm:$0xff]  }
  0x75   : > { %1591 = vmatprep.subr.bf16.mxu1 %v1783_v7  ;;  %v1800_v53 = vld [vmem:[#allocation6 + $0xb0] sm:$0xff]   ;;  %v1801_v54 = vld [vmem:[#allocation6 + $0xb8] sm:$0xff]   ;;  %v1802_v55 = vld [vmem:[#allocation8] sm:$0xff]   ;;  %s1916_s9 = sshll.u32 %s1989_s19, 4  ;;  %s1917_s9 = int_to_ptr.vmem [resolvable:$false] %s1916_s9 }
  0x76   : > { %v304_v41 = vor.u32 %v302_v34, %v301_v40  ;;  %v1803_v56 = vld [vmem:[#allocation8 + $0x40] sm:$0xff]   ;;  %v1804_v57 = vld [vmem:[#allocation8 + $0x8] sm:$0xff]   ;;  %v1806_v59 = vld [vmem:[#allocation8 + $0x10] sm:$0xff]   ;;  %s1918_s10 = scalar_lea.vmem %s1917_s9, 512  ;;  %p1919_p7 = scmp.lt.s32.totalorder %s2302_s7, %s1917_s9 }
  0x77   : > { %1568 = vmatpush3.bf16.msra.mxu0 %v1782_v6  ;;  %v284_v32 = vld [vmem:[#allocation2] sm:$0xff]  ;;  %v1805_v58 = vld [vmem:[#allocation8 + $0x48] sm:$0xff]   ;;  %v1807_v60 = vld [vmem:[#allocation8 + $0x50] sm:$0xff]   ;;  %p1920_p9 = scmp.lt.s32.totalorder %s1918_s10, %s1912_s5 }
  0x78   : > { %1592 = vmatpush3.bf16.msra.mxu1 %v1783_v7  ;;  %1569 = vmatprep.subr.bf16.mxu0 %v1784_v10  ;;  %v2240_v36 = vsel %vm2229_vm6, %v279_v27, %v284_v32  ;;  %v287_v37 = vld [vmem:[#allocation2 + $0x8] sm:$0x1]  ;;  %v1808_v61 = vld [vmem:[#allocation8 + $0x18] sm:$0xff]   ;;  %v1810_v63 = vld [vmem:[#allocation8 + $0x20] sm:$0xff]  }
  0x79   : > { %1593 = vmatprep.subr.bf16.mxu1 %v1785_v11  ;;  %1577 = vmatprep.mubr.bf16.mxu0 %v2240_v36  ;;  %v288_v38 = vsel %vm2214_vm3, %v276_v24, %v287_v37  ;;  %v1809_v62 = vld [vmem:[#allocation8 + $0x58] sm:$0xff]   ;;  %v1811_v0 = vld [vmem:[#allocation8 + $0x60] sm:$0xff]   ;;  %v1812_v1 = vld [vmem:[#allocation8 + $0x28] sm:$0xff]   ;;  %p1921_p12 = por %p1920_p9, %p1919_p7 }
  0x7a   : > { %289 = vst [vmem:[#allocation2 + $0x8] sm:$0x1] %v288_v38  ;;  %1601 = vmatprep.mubr.bf16.mxu1 %v2240_v36  ;;  %v307_v42 = vld [vmem:[#allocation2 + $0x10] sm:$0xff]  ;;  %v1813_v2 = vld [vmem:[#allocation8 + $0x68] sm:$0xff]   ;;  %v1816_v5 = vld [vmem:[#allocation8 + $0x38] sm:$0xff]  }
  0x7b   : > { %1570 = vmatpush3.bf16.msra.mxu0 %v1784_v10  ;;  %v310_v44 = vld [vmem:[#allocation2 + $0x18] sm:$0x1]  ;;  %v2248_v45 = vsel %vm2229_vm6, %v304_v41, %v307_v42  ;;  %v1814_v3 = vld [vmem:[#allocation8 + $0x30] sm:$0xff]   ;;  %v2256_v7 = vld [vmem:[#allocation8 + $0x80] sm:$0xff]   ;;  %p1922_p1 = pnand %p1921_p12, %p1915_p3 }
  0x7c   : > { %1594 = vmatpush3.bf16.msra.mxu1 %v1785_v11  ;;  %1571 = vmatprep.subr.bf16.mxu0 %v1786_v12  ;;  %v311_v46 = vsel %vm2214_vm3, %v301_v40, %v310_v44  ;;  %v1815_v4 = vld [vmem:[#allocation8 + $0x70] sm:$0xff]   ;;  %v1817_v6 = vld [vmem:[#allocation8 + $0x78] sm:$0xff]   ;;  %v1823_v22 = vld [vmem:[#allocation8 + $0xa8] sm:$0xff]  }
  0x7d   : > { %1595 = vmatprep.subr.bf16.mxu1 %v1787_v13  ;;  %312 = vst [vmem:[#allocation2 + $0x18] sm:$0x1] %v311_v46 }
  0x7f   : > { %1572 = vmatpush3.bf16.msra.mxu0 %v1786_v12 }
  0x80   : > { %1596 = vmatpush3.bf16.msra.mxu1 %v1787_v13  ;;  %1573 = vmatprep.subr.bf16.mxu0 %v1788_v19 }
  0x81   : > { %1597 = vmatprep.subr.bf16.mxu1 %v1789_v23  ;;  %v314_v47 = vld [vmem:[#allocation2 + $0x8] sm:$0xff] }
  0x83   : > { %1574 = vmatpush3.bf16.msra.mxu0 %v1788_v19 }
  0x84   : > { %1598 = vmatpush3.bf16.msra.mxu1 %v1789_v23  ;;  %1575 = vmatprep.subr.bf16.mxu0 %v1790_v25  ;;  %v316_v50 = vld [vmem:[#allocation2 + $0x18] sm:$0xff] }
  0x85   : > { %1599 = vmatprep.subr.bf16.mxu1 %v1791_v31 }
  0x87   : > { %1576 = vmatpush3.bf16.msra.mxu0 %v1790_v25 }
  0x88   : > { %1600 = vmatpush3.bf16.msra.mxu1 %v1791_v31  ;;  %1609 = vmatprep.subr.bf16.mxu0 %v1793_v39 }
  0x89   : > { %1633 = vmatprep.subr.bf16.mxu1 %v1802_v55 }
  0x8a   : > { %1578 = vmatmul.mubr.bf16.vlgmr.msra.gmra.mrb[0].mxu0 %v314_v47 }
  0x8b   : > { %1602 = vmatmul.mubr.bf16.vlgmr.msra.gmra.mrb[0].mxu1 %v314_v47  ;;  %1610 = vmatpush3.bf16.msra.mxu0 %v1793_v39 }
  0x8c   : > { %1605 = vmatprep.mubr.bf16.mxu1 %v2248_v45  ;;  %1611 = vmatprep.subr.bf16.mxu0 %v1794_v43 }
  0x8d   : > { %1581 = vmatprep.mubr.bf16.mxu0 %v2248_v45  ;;  %1634 = vmatpush3.bf16.msra.mxu1 %v1802_v55 }
  0x8e   : > { %1635 = vmatprep.subr.bf16.mxu1 %v1804_v57 }
  0x8f   : > { %1612 = vmatpush3.bf16.msra.mxu0 %v1794_v43 }
  0x90   : > { %1613 = vmatprep.subr.bf16.mxu0 %v1795_v48 }
  0x91   : > { %1636 = vmatpush3.bf16.msra.mxu1 %v1804_v57 }
  0x92   : > { %1582 = vmatmul.mubr.bf16.gmra.mrb[4].mxu0 %v316_v50  ;;  %1637 = vmatprep.subr.bf16.mxu1 %v1806_v59 }
  0x93   : > { %1606 = vmatmul.mubr.bf16.gmra.mrb[4].mxu1 %v316_v50  ;;  %1614 = vmatpush3.bf16.msra.mxu0 %v1795_v48 }
  0x94   : > { %1625 = vmatprep.mubr.bf16.mxu0 %v2240_v36  ;;  %1615 = vmatprep.subr.bf16.mxu0 %v1796_v49 }
  0x95   : > { %1638 = vmatpush3.bf16.msra.mxu1 %v1806_v59 }
  0x96   : > { %1639 = vmatprep.subr.bf16.mxu1 %v1808_v61 }
  0x97   : > { %1616 = vmatpush3.bf16.msra.mxu0 %v1796_v49  ;;  %v1421_v49 = vld [vmem:[%s2349_s3] ss:$0 sm:$0xff] }
  0x98   : > { %1617 = vmatprep.subr.bf16.mxu0 %v1797_v51 }
  0x99   : > { %1640 = vmatpush3.bf16.msra.mxu1 %v1808_v61 }
  0x9a   : > { %1641 = vmatprep.subr.bf16.mxu1 %v1810_v63 }
  0x9b   : > { %1618 = vmatpush3.bf16.msra.mxu0 %v1797_v51 }
  0x9c   : > { %1619 = vmatprep.subr.bf16.mxu0 %v1799_v52 }
  0x9d   : > { %1642 = vmatpush3.bf16.msra.mxu1 %v1810_v63 }
  0x9e   : > { %1643 = vmatprep.subr.bf16.mxu1 %v1812_v1 }
  0x9f   : > { %1620 = vmatpush3.bf16.msra.mxu0 %v1799_v52 }
  0xa0   : > { %1621 = vmatprep.subr.bf16.mxu0 %v1800_v53 }
  0xa1   : > { %1644 = vmatpush3.bf16.msra.mxu1 %v1812_v1 }
  0xa2   : > { %1645 = vmatprep.subr.bf16.mxu1 %v1814_v3 }
  0xa3   : > { %1622 = vmatpush3.bf16.msra.mxu0 %v1800_v53 }
  0xa4   : > { %1623 = vmatprep.subr.bf16.mxu0 %v1801_v54 }
  0xa5   : > { %1646 = vmatpush3.bf16.msra.mxu1 %v1814_v3 }
  0xa6   : > { %1647 = vmatprep.subr.bf16.mxu1 %v1816_v5 }
  0xa7   : > { %1624 = vmatpush3.bf16.msra.mxu0 %v1801_v54 }
  0xa8   : > { %1657 = vmatprep.subr.bf16.mxu0 %v1803_v56 }
  0xa9   : > { %1648 = vmatpush3.bf16.msra.mxu1 %v1816_v5 }
  0xaa   : > { %1626 = vmatmul.mubr.bf16.vlgmr.msra.gmra.mrb[8].mxu0 %v314_v47  ;;  %1681 = vmatprep.subr.bf16.mxu1 %v2256_v7 }
  0xab   : > { %1629 = vmatprep.mubr.bf16.mxu0 %v2248_v45  ;;  %1658 = vmatpush3.bf16.msra.mxu0 %v1803_v56 }
  0xac   : > { %1659 = vmatprep.subr.bf16.mxu0 %v1805_v58 }
  0xaf   : > { %1660 = vmatpush3.bf16.msra.mxu0 %v1805_v58 }
  0xb0   : > { %1661 = vmatprep.subr.bf16.mxu0 %v1807_v60 }
  0xb2   : > { %1630 = vmatmul.mubr.bf16.gmra.mrb[12].mxu0 %v316_v50 }
  0xb3   : > { %1662 = vmatpush3.bf16.msra.mxu0 %v1807_v60 }
  0xb4   : > { %1663 = vmatprep.subr.bf16.mxu0 %v1809_v62 }
  0xb7   : > { %1664 = vmatpush3.bf16.msra.mxu0 %v1809_v62 }
  0xb8   : > { %1665 = vmatprep.subr.bf16.mxu0 %v1811_v0 }
  0xbb   : > { %1666 = vmatpush3.bf16.msra.mxu0 %v1811_v0 }
  0xbc   : > { %1667 = vmatprep.subr.bf16.mxu0 %v1813_v2 }
  0xbf   : > { %1668 = vmatpush3.bf16.msra.mxu0 %v1813_v2 }
  0xc0   : > { %1669 = vmatprep.subr.bf16.mxu0 %v1815_v4 }
  0xc3   : > { %1670 = vmatpush3.bf16.msra.mxu0 %v1815_v4 }
  0xc4   : > { %1671 = vmatprep.subr.bf16.mxu0 %v1817_v6 }
  0xc7   : > { %1672 = vmatpush3.bf16.msra.mxu0 %v1817_v6 }
 0x15d   : > { %v1579_v9 = vpop.f32.mrb[0].mxu0 }
 0x15e   : > { %v1603_v10 = vpop.f32.mrb[0].mxu1  ;;  %v415_v11 = vpop.f32.mrb[1].mxu0  ;;  %v746_v9 = vld [vmem:[#allocation2 + $0x8] sm:$0x1] }
 0x15f   : > { %v541_v12 = vpop.f32.mrb[1].mxu1  ;;  %v706_v13 = vrot.slane %v1603_v10, 1  ;;  %v1580_v15 = vpop.f32.mrb[2].mxu0 }
 0x160   : > { %v703_v14 = vrot.slane %v541_v12, 1  ;;  %v1604_v16 = vpop.f32.mrb[2].mxu1  ;;  %v418_v17 = vpop.f32.mrb[3].mxu0 }
 0x161   : > { %v544_v18 = vpop.f32.mrb[3].mxu1 }
 0x162   : > { %v704_v19 = vrot.slane %v544_v18, 1 }
 0x164   : > { %v705_v20 = vsel %vm702_vm7, %v703_v14, %v704_v19  ;;  %v707_v21 = vsel %vm702_vm7, %v704_v19, %v706_v13 }
 0x165   : > { %v710_v23 = vadd.f32 %v705_v20, %v415_v11  ;;  %v711_v24 = vadd.f32 %v707_v21, %v418_v17  ;;  %v1583_v26 = vpop.f32.mrb[4].mxu0  ;;  %v790_v21 = vld [vmem:[#allocation2 + $0x18] sm:$0x1] }
 0x166   : > { %v1607_v25 = vpop.f32.mrb[4].mxu1  ;;  %v429_v28 = vpop.f32.mrb[5].mxu0 }
 0x167   : > { %v556_v27 = vpop.f32.mrb[5].mxu1  ;;  %v755_v29 = vrot.slane %v1607_v25, 1  ;;  %v1584_v32 = vpop.f32.mrb[6].mxu0  ;;  %v1819_v25 = vld [vmem:[#allocation8 + $0x88] sm:$0xff]  }
 0x168   : > { %v752_v30 = vrot.slane %v556_v27, 1  ;;  %v1608_v31 = vpop.f32.mrb[6].mxu1  ;;  %v432_v34 = vpop.f32.mrb[7].mxu0 }
 0x169   : > { %v559_v33 = vpop.f32.mrb[7].mxu1  ;;  %v1822_v31 = vld [vmem:[#allocation8 + $0xa0] sm:$0xff]  }
 0x16a   : > { %v753_v35 = vrot.slane %v559_v33, 1 }
 0x16c   : > { %v754_v37 = vsel %vm702_vm7, %v752_v30, %v753_v35  ;;  %v756_v38 = vsel %vm702_vm7, %v753_v35, %v755_v29  ;;  %v1820_v29 = vld [vmem:[#allocation8 + $0x90] sm:$0xff]   ;;  %v1821_v30 = vld [vmem:[#allocation8 + $0x98] sm:$0xff]  }
 0x16d   : > { %v759_v39 = vadd.f32 %v754_v37, %v429_v28  ;;  %v760_v40 = vadd.f32 %v756_v38, %v432_v34 }
 0x17d   : > { %v1627_v41 = vpop.f32.mrb[8].mxu0 }
 0x17e   : > { %v669_v42 = vpop.f32.mrb[9].mxu0  ;;  %v719_v46 = vrot.slane %v1627_v41, 2 }
 0x17f   : > { %v1628_v43 = vpop.f32.mrb[10].mxu0  ;;  %v716_v47 = vrot.slane %v669_v42, 2 }
 0x180   : > { %v672_v44 = vpop.f32.mrb[11].mxu0 }
 0x181   : > { %v717_v48 = vrot.slane %v672_v44, 2 }
 0x183   : > { %v718_v50 = vsel %vm715_vm8, %v716_v47, %v717_v48  ;;  %v720_v51 = vsel %vm715_vm8, %v717_v48, %v719_v46 }
 0x184   : > { %v723_v52 = vadd.f32 %v718_v50, %v710_v23  ;;  %v724_v53 = vadd.f32 %v720_v51, %v711_v24 }
 0x185   : > { %v1631_v54 = vpop.f32.mrb[12].mxu0 }
 0x186   : > { %v729_v55 = vadd.f32 %v1421_v49, %v723_v52  ;;  %v730_v56 = vadd.f32 %v1421_v49, %v724_v53  ;;  %v684_v57 = vpop.f32.mrb[13].mxu0  ;;  %v767_v58 = vrot.slane %v1631_v54, 2 }
 0x187   : > { %v764_v59 = vrot.slane %v684_v57, 2  ;;  %v1632_v60 = vpop.f32.mrb[14].mxu0 }
 0x188   : > { %v731_v61 = vmax.f32 %v729_v55, 0.0  ;;  %v732_v62 = vmax.f32 %v730_v56, 0.0  ;;  %v687_v63 = vpop.f32.mrb[15].mxu0 }
 0x189   : > { %v765_v0 = vrot.slane %v687_v63, 2 }
 0x18a   : > { %v733_v1 = vpack.c.bf16 %v732_v62, %v731_v61 }
 0x18b   : > { %v766_v2 = vsel %vm715_vm8, %v764_v59, %v765_v0  ;;  %v768_v3 = vsel %vm715_vm8, %v765_v0, %v767_v58 }
 0x18c   : > { %v735_v4 = vshrl.u32 %v733_v1, 16  ;;  %v771_v5 = vadd.f32 %v766_v2, %v759_v39  ;;  %v772_v6 = vadd.f32 %v768_v3, %v760_v40  ;;  %v738_v11 = vshll.u32 %v733_v1, 16 }
 0x18e   : > { %v737_v10 = vrot.slane %v735_v4, 7  ;;  %v773_v12 = vadd.f32 %v1421_v49, %v771_v5  ;;  %v774_v13 = vadd.f32 %v1421_v49, %v772_v6 }
 0x190   : > { %v740_v14 = vor.u32 %v738_v11, %v737_v10  ;;  %v747_v15 = vsel %vm2214_vm3, %v737_v10, %v746_v9  ;;  %v775_v16 = vmax.f32 %v773_v12, 0.0  ;;  %v776_v17 = vmax.f32 %v774_v13, 0.0  ;;  %v1470_v9 = vld [vmem:[%s2204_s25] sm:$0xff]  }
 0x191   : > { %748 = vst [vmem:[#allocation2 + $0x8] sm:$0x1] %v747_v15  ;;  %v1446_v10 = vld [vmem:[%s2349_s3 + $0x1] ss:$0 sm:$0xff]  ;;  %v1471_v15 = vunpack.c.l.bf16 %v1470_v9 }
 0x192   : > { %v744_v18 = vsel %vm2229_vm6, %v740_v14, %v2240_v36  ;;  %v777_v19 = vpack.c.bf16 %v776_v17, %v775_v16  ;;  %v1472_v16 = vunpack.c.h.bf16 %v1470_v9 }
 0x193   : > { %745 = vst [vmem:[#allocation2] sm:$0xff] %v744_v18  ;;  %1649 = vmatprep.mubr.bf16.mxu1 %v744_v18  ;;  %1673 = vmatprep.mubr.bf16.mxu0 %v744_v18 }
 0x194   : > { %v779_v20 = vshrl.u32 %v777_v19, 16  ;;  %v782_v24 = vshll.u32 %v777_v19, 16 }
 0x196   : > { %v781_v23 = vrot.slane %v779_v20, 7 }
 0x198   : > { %v784_v26 = vor.u32 %v782_v24, %v781_v23  ;;  %v791_v27 = vsel %vm2214_vm3, %v781_v23, %v790_v21  ;;  %v794_v28 = vld [vmem:[#allocation2 + $0x8] sm:$0xff] }
 0x199   : > { %792 = vst [vmem:[#allocation2 + $0x18] sm:$0x1] %v791_v27  ;;  %1650 = vmatmul.mubr.bf16.vlgmr.msra.gmra.mrb[8].mxu1 %v794_v28  ;;  %1674 = vmatmul.mubr.bf16.vlgmr.msra.gmra.mrb[16].mxu0 %v794_v28 }
 0x19a   : > { %v788_v36 = vsel %vm2229_vm6, %v784_v26, %v2248_v45  ;;  %1682 = vmatpush3.bf16.msra.mxu1 %v2256_v7  ;;  %v1824_v45 = vld [vmem:[#allocation8 + $0xb0] sm:$0xff]   ;;  %v1825_v7 = vld [vmem:[#allocation8 + $0xb8] sm:$0xff]  }
 0x19b   : > { %789 = vst [vmem:[#allocation2 + $0x10] sm:$0xff] %v788_v36  ;;  %1683 = vmatprep.subr.bf16.mxu1 %v1819_v25  ;;  %1653 = vmatprep.mubr.bf16.mxu1 %v788_v36  ;;  %v1487_v26 = vld [vmem:[%s2204_s25 + $0x8] sm:$0xff]  }
 0x19c   : > { %1677 = vmatprep.mubr.bf16.mxu0 %v788_v36 }
 0x19e   : > { %1684 = vmatpush3.bf16.msra.mxu1 %v1819_v25 }
 0x19f   : > { %1685 = vmatprep.subr.bf16.mxu1 %v1820_v29 }
 0x1a0   : > { %v796_v8 = vld [vmem:[#allocation2 + $0x18] sm:$0xff] }
 0x1a1   : > { %1654 = vmatmul.mubr.bf16.gmra.mrb[12].mxu1 %v796_v8  ;;  %1678 = vmatmul.mubr.bf16.gmra.mrb[20].mxu0 %v796_v8 }
 0x1a2   : > { %1686 = vmatpush3.bf16.msra.mxu1 %v1820_v29  ;;  %1697 = vmatprep.mubr.bf16.mxu1 %v744_v18 }
 0x1a3   : > { %1687 = vmatprep.subr.bf16.mxu1 %v1821_v30 }
 0x1a6   : > { %1688 = vmatpush3.bf16.msra.mxu1 %v1821_v30 }
 0x1a7   : > { %1689 = vmatprep.subr.bf16.mxu1 %v1822_v31 }
 0x1aa   : > { %1690 = vmatpush3.bf16.msra.mxu1 %v1822_v31 }
 0x1ab   : > { %1691 = vmatprep.subr.bf16.mxu1 %v1823_v22 }
 0x1ae   : > { %1692 = vmatpush3.bf16.msra.mxu1 %v1823_v22  ;;  %v1480_v22 = vunpack.c.l.bf16 %v1487_v26 }
 0x1af   : > { %1693 = vmatprep.subr.bf16.mxu1 %v1824_v45 }
 0x1b2   : > { %1694 = vmatpush3.bf16.msra.mxu1 %v1824_v45 }
 0x1b3   : > { %1695 = vmatprep.subr.bf16.mxu1 %v1825_v7 }
 0x1b6   : > { %1696 = vmatpush3.bf16.msra.mxu1 %v1825_v7 }
 0x1b9   : > { %1698 = vmatmul.mubr.bf16.vlgmr.msra.gmra.mrb[16].mxu1 %v794_v28 }
 0x1ba   : > { %1701 = vmatprep.mubr.bf16.mxu1 %v788_v36 }
 0x1c1   : > { %1702 = vmatmul.mubr.bf16.gmra.mrb[20].mxu1 %v796_v8 }
 0x26c   : > { %v1651_v32 = vpop.f32.mrb[8].mxu1  ;;  %v1675_v33 = vpop.f32.mrb[16].mxu0 }
 0x26d   : > { %v895_v34 = vpop.f32.mrb[9].mxu1  ;;  %v1021_v35 = vpop.f32.mrb[17].mxu0  ;;  %v1185_v41 = vrot.slane %v1675_v33, 1  ;;  %v1481_v33 = vunpack.c.h.bf16 %v1487_v26 }
 0x26e   : > { %v1652_v37 = vpop.f32.mrb[10].mxu1  ;;  %v1676_v38 = vpop.f32.mrb[18].mxu0  ;;  %v1182_v42 = vrot.slane %v1021_v35, 1 }
 0x26f   : > { %v898_v39 = vpop.f32.mrb[11].mxu1  ;;  %v1024_v40 = vpop.f32.mrb[19].mxu0 }
 0x270   : > { %v1183_v43 = vrot.slane %v1024_v40, 1 }
 0x272   : > { %v1184_v44 = vsel %vm702_vm7, %v1182_v42, %v1183_v43  ;;  %v1186_v46 = vsel %vm702_vm7, %v1183_v43, %v1185_v41 }
 0x273   : > { %v1189_v47 = vadd.f32 %v1184_v44, %v895_v34  ;;  %v1190_v48 = vadd.f32 %v1186_v46, %v898_v39 }
 0x274   : > { %v1655_v49 = vpop.f32.mrb[12].mxu1  ;;  %v1679_v50 = vpop.f32.mrb[20].mxu0 }
 0x275   : > { %v909_v51 = vpop.f32.mrb[13].mxu1  ;;  %v1036_v52 = vpop.f32.mrb[21].mxu0  ;;  %v1233_v57 = vrot.slane %v1679_v50, 1 }
 0x276   : > { %v1656_v53 = vpop.f32.mrb[14].mxu1  ;;  %v1680_v54 = vpop.f32.mrb[22].mxu0  ;;  %v1230_v58 = vrot.slane %v1036_v52, 1 }
 0x277   : > { %v912_v55 = vpop.f32.mrb[15].mxu1  ;;  %v1039_v56 = vpop.f32.mrb[23].mxu0 }
 0x278   : > { %v1231_v59 = vrot.slane %v1039_v56, 1 }
 0x27a   : > { %v1232_v60 = vsel %vm702_vm7, %v1230_v58, %v1231_v59  ;;  %v1234_v61 = vsel %vm702_vm7, %v1231_v59, %v1233_v57 }
 0x27b   : > { %v1237_v62 = vadd.f32 %v1232_v60, %v909_v51  ;;  %v1238_v63 = vadd.f32 %v1234_v61, %v912_v55 }
 0x28c   : > { %v1699_v0 = vpop.f32.mrb[16].mxu1 }
 0x28d   : > { %v1149_v1 = vpop.f32.mrb[17].mxu1  ;;  %v1197_v4 = vrot.slane %v1699_v0, 2 }
 0x28e   : > { %v1700_v2 = vpop.f32.mrb[18].mxu1  ;;  %v1194_v5 = vrot.slane %v1149_v1, 2 }
 0x28f   : > { %v1152_v3 = vpop.f32.mrb[19].mxu1 }
 0x290   : > { %v1195_v6 = vrot.slane %v1152_v3, 2 }
 0x292   : > { %v1196_v11 = vsel %vm715_vm8, %v1194_v5, %v1195_v6  ;;  %v1198_v12 = vsel %vm715_vm8, %v1195_v6, %v1197_v4 }
 0x293   : > { %v1201_v13 = vadd.f32 %v1196_v11, %v1189_v47  ;;  %v1202_v14 = vadd.f32 %v1198_v12, %v1190_v48 }
 0x294   : > { %v1703_v17 = vpop.f32.mrb[20].mxu1 }
 0x295   : > { %v1207_v18 = vadd.f32 %v1446_v10, %v1201_v13  ;;  %v1208_v19 = vadd.f32 %v1446_v10, %v1202_v14  ;;  %v1164_v20 = vpop.f32.mrb[21].mxu1  ;;  %v1245_v27 = vrot.slane %v1703_v17, 2 }
 0x296   : > { %v1704_v21 = vpop.f32.mrb[22].mxu1  ;;  %v1242_v28 = vrot.slane %v1164_v20, 2 }
 0x297   : > { %v1213_v23 = vadd.f32 %v1471_v15, %v1207_v18  ;;  %v1214_v24 = vadd.f32 %v1472_v16, %v1208_v19  ;;  %v1167_v25 = vpop.f32.mrb[23].mxu1 }
 0x298   : > { %v1243_v36 = vrot.slane %v1167_v25, 2 }
 0x299   : > { %v1215_v29 = vmax.f32 %v1213_v23, 0.0  ;;  %v1216_v30 = vmax.f32 %v1214_v24, 0.0 }
 0x29a   : > { %v1244_v8 = vsel %vm715_vm8, %v1242_v28, %v1243_v36  ;;  %v1246_v31 = vsel %vm715_vm8, %v1243_v36, %v1245_v27 }
 0x29b   : > { %v1476_v45 = vpack.c.bf16 %v1216_v30, %v1215_v29  ;;  %v1249_v7 = vadd.f32 %v1244_v8, %v1237_v62  ;;  %v1250_v32 = vadd.f32 %v1246_v31, %v1238_v63 }
 0x29d   : > { %v1251_v34 = vadd.f32 %v1446_v10, %v1249_v7  ;;  %v1252_v35 = vadd.f32 %v1446_v10, %v1250_v32  ;;  %1477 = vst [vmem:[%s245_s30] sm:$0xff] %v1476_v45  }
 0x29f   : > { %v1257_v37 = vadd.f32 %v1480_v22, %v1251_v34  ;;  %v1258_v38 = vadd.f32 %v1481_v33, %v1252_v35 }
 0x2a1   : > { %v1259_v39 = vmax.f32 %v1257_v37, 0.0  ;;  %v1260_v40 = vmax.f32 %v1258_v38, 0.0 }
 0x2a3   : > { %v1485_v41 = vpack.c.bf16 %v1260_v40, %v1259_v39 }
 0x2a5   : > { %1488 = vst [vmem:[%s245_s30 + $0x8] sm:$0xff] %v1485_v41  }
 0x2a6   : > { %1925 = shalt.err (!%p1922_p1)
}
 0x2a7   : > { %s1926_s24 = scalar_lea.hbm %s2300_s20, 256  ;;  %s1930_s23 = scalar_lea.hbm %s2350_s4, 512 }
 0x2a8   : > { %p1927_p13 = scmp.ne.s32.totalorder %s2300_s20, %s1926_s24  ;;  %p1931_p4 = scmp.lt.u32.totalorder %s2300_s20, %s2350_s4 }
 0x2a9   : > { %p1932_p5 = scmp.lt.u32.totalorder %s1930_s23, %s1926_s24  ;;  %p1934_p11 = scmp.lt.u32.totalorder %s1926_s24, %s2300_s20 }
 0x2aa   : > { %p1928_p6 = pnand %p1927_p13, %p2370_p0 }
 0x2ab   : > { %p1933_p8 = por %p1932_p5, %p1931_p4 }
 0x2ac   : > { %p1929_p10 = pneg %p1928_p6 }
 0x2ad   : > { %p1935_p2 = por %p1934_p11, %p1933_p8 }
 0x2af   : > { %p1936_p3 = pnand %p1935_p2, %p1929_p10 }
 0x2b1   : > { %1939 = shalt.err (!%p1936_p3)
}
 0x2b2   : > { %s1990_s30 = smov 64   ;;  %s1991_s6 = smov 4  }
 0x2b3   : > { %1715 = dma.vmem_to_hbm [thread:$0]  (%p2370_p0), %s2302_s7, 256, %s2300_s20, %s1273_s29, %s1990_s30, %s1990_s30, %s1991_s6  }
 0x2b4 PF: > { %s1302_s28 = sand.u32 1, %s1970_s15   ;;  %p2371_p7 = scmp.ne.s32.totalorder %s2355_s22, 0 }
 0x2b5   : > { %p2372_p9 = scmp.ge.s32.totalorder %s1982_s18, 2  ;;  %s1303_s27 = scalar_lea.sflag [#allocation5], %s1302_s28 }
 0x2b7   : > { %p1729_p12 = pnand %p2372_p9, %p2371_p7 }
 0x2b9   : > { %1965 = dma.done.wait (!%p1729_p12), %s1303_s27, 256  }
 0x2ba   : > { %1967 = vsyncadd (!%p1729_p12), %s1303_s27, 4294967040  ;;  %p18_p1 = scmp.ge.s32.totalorder %s2133_s26, 4   ;;  %s2373_s15 = smov %s1974_s16 }
 0x2bb   : > { %s2374_s16 = smov %s1978_s17  ;;  %s2375_s17 = smov %s2149_s14 }
 0x2bc   : > { %s2376_s18 = smov %s2133_s26  ;;  %20 = sbr.rel (!%p18_p1) target bundleno = 6 (0x6), region = 95 }
 0x2c3   :  { %1308 = vsyncpa [#allocation4], 1 }
 0x2c4   :  { %1310 = vsyncpa [#allocation4 + $0x1], 1 }
 0x2c5   :  { %1311 = vsyncpa [#allocation7], 1 }
 0x2c6   :  { %1312 = vsyncpa [#allocation5], 1 }
 0x2c7   :  { %1314 = vsyncpa [#allocation5 + $0x1], 1 }

</bundles_post_ra>
